<compile_context>
chip_gen: v7x
topology: tpu7x:2x2x1
jax: 0.10.0
libtpu: 0.0.40
codegen_flags: <defaults>
</compile_context>

<pallas_src>
import math
import functools

import jax
import jax.numpy as jnp
from jax.experimental import pallas as pl
from jax.experimental.pallas import tpu as pltpu


def make_pos_embedding(emb_size: int, maxlen: int) -> jnp.ndarray:
    """Deterministic construction identical to the PyTorch __init__ buffer."""
    den = jnp.exp(
        -jnp.arange(0, emb_size, 2, dtype=jnp.float32) * math.log(10000.0) / emb_size
    )
    pos = jnp.arange(0, maxlen, dtype=jnp.float32)[:, None]          # (maxlen, 1)
    pe = jnp.zeros((maxlen, emb_size), dtype=jnp.float32)
    pe = pe.at[:, 0::2].set(jnp.sin(pos * den))
    pe = pe.at[:, 1::2].set(jnp.cos(pos * den))
    return pe[:, None, :]                                            # (maxlen, 1, E)


def _pe_add_kernel(x_ref, pos_ref, o_ref, *, batch):
    # x_ref: (ts, B*E)   pos_ref: (ts, E)   o_ref: (ts, B*E)
    pos = pos_ref[...]
    if batch > 1:
        # Lane-replicate pos across the batch: out[:, b*E:(b+1)*E] += pos.
        pos = jnp.concatenate([pos] * batch, axis=-1)
    o_ref[...] = x_ref[...] + pos


def _pe_add_dropout_kernel(x_ref, pos_ref, mask_ref, o_ref, *, batch):
    # mask_ref holds the pre-scaled inverted-dropout multiplier: keep/(1-p).
    pos = pos_ref[...]
    if batch > 1:
        pos = jnp.concatenate([pos] * batch, axis=-1)
    o_ref[...] = (x_ref[...] + pos) * mask_ref[...]


def _row_tile(n_rows: int, row_bytes: int, target_bytes: int = 2 * 1024 * 1024) -> int:
    """Pick a row-tile (multiple of 8) giving ~2 MiB blocks; keeps double/triple
    buffered operands well under the scoped-VMEM default on v5e/v6e/v7x."""
    if n_rows <= 8:
        return n_rows
    t = max(8, (target_bytes // max(1, row_bytes)) // 8 * 8)
    return int(min(n_rows, t))


def positional_encoding_pallas(x, pos_embedding, *, dropout_p, key=None, training=True):
    S, B, E = x.shape
    dtype = x.dtype
    cols = B * E

    # Lane-dense 2-D view of the contiguous activation buffer (free reshape).
    x2d = x.reshape(S, cols)
    # Slice / squeeze / cast the pos buffer once in the wrapper.
    pos2d = pos_embedding[:S, 0, :].astype(dtype)                    # (S, E)

    ts = _row_tile(S, cols * jnp.dtype(dtype).itemsize)
    grid = (pl.cdiv(S, ts),)

    x_spec = pl.BlockSpec((ts, cols), lambda i: (i, 0))
    pos_spec = pl.BlockSpec((ts, E), lambda i: (i, 0))
    out_spec = pl.BlockSpec((ts, cols), lambda i: (i, 0))

    use_dropout = training and dropout_p > 0.0
    if use_dropout:
        if key is None:
            key = jax.random.PRNGKey(0)
        # TODO(synk): in-kernel pltpu.prng_random_bits would avoid streaming this
        # mask from HBM, but it has no interpret/CPU lowering; precompute instead.
        keep = jax.random.bernoulli(key, 1.0 - dropout_p, shape=(S, cols))
        mask = (keep.astype(jnp.float32) * (1.0 / (1.0 - dropout_p))).astype(dtype)
        kernel = functools.partial(_pe_add_dropout_kernel, batch=B)
        in_specs = [x_spec, pos_spec, x_spec]
        args = (x2d, pos2d, mask)
    else:
        kernel = functools.partial(_pe_add_kernel, batch=B)
        in_specs = [x_spec, pos_spec]
        args = (x2d, pos2d)

    out2d = pl.pallas_call(
        kernel,
        out_shape=jax.ShapeDtypeStruct((S, cols), dtype),
        grid=grid,
        in_specs=in_specs,
        out_specs=out_spec,
        # No cross-step carry (mask is precomputed), so the grid axis is
        # embarrassingly parallel -> lets v7x shard it across both TensorCores.
        compiler_params=pltpu.CompilerParams(dimension_semantics=("parallel",)),
    )(*args)
    return out2d.reshape(S, B, E)


if __name__ == "__main__":
    S, B, E, MAXLEN = 8, 2, 32, 64
    key = jax.random.PRNGKey(0)
    kx, kd = jax.random.split(key)
    x = jax.random.normal(kx, (S, B, E), dtype=jnp.float32)
    pos_emb = make_pos_embedding(E, MAXLEN)

    # Eval-mode path (dropout is identity): exact check vs pure-JAX reference.
    out_eval = positional_encoding_pallas(x, pos_emb, dropout_p=0.1, training=False)
    jax.block_until_ready(out_eval)
    ref = x + pos_emb[:S]
    assert out_eval.shape == (S, B, E)
    assert jnp.allclose(out_eval, ref, atol=1e-6), "eval mismatch vs reference"

    # Train-mode path: inverted dropout applied to (x + pos).
    p = 0.1
    out_train = positional_encoding_pallas(x, pos_emb, dropout_p=p, key=kd, training=True)
    jax.block_until_ready(out_train)
    assert out_train.shape == (S, B, E)
    scale = 1.0 / (1.0 - p)
    ok = jnp.isclose(out_train, 0.0, atol=1e-6) | jnp.isclose(
        out_train, ref * scale, rtol=1e-5, atol=1e-5
    )
    assert bool(jnp.all(ok)), "train-mode values are not in {0, (x+pos)/(1-p)}"

    print("KERNEL_OK")
</pallas_src>

<mosaic_0001>
module attributes {stable_mosaic.version = 11 : i64} {
  func.func @_pe_add_kernel(%arg0: i32, %arg1: memref<8x64xf32, #tpu.memory_space<vmem>>, %arg2: memref<8x32xf32, #tpu.memory_space<vmem>>, %arg3: memref<8x64xf32, #tpu.memory_space<vmem>>) attributes {dimension_semantics = [#tpu.dimension_semantics<parallel>], iteration_bounds = array<i64: 1>, scalar_prefetch = 0 : i64, scratch_operands = 0 : i64, tpu.core_type = #tpu.core_type<tc>, window_params = [{transform_indices = @transform_0, window_bounds = array<i64: 8, 64>}, {transform_indices = @transform_1, window_bounds = array<i64: 8, 32>}, {transform_indices = @transform_2, window_bounds = array<i64: 8, 64>}]} {
    %c0 = arith.constant 0 : index
    %c0_0 = arith.constant 0 : index
    %0 = vector.load %arg2[%c0, %c0_0] : memref<8x32xf32, #tpu.memory_space<vmem>>, vector<8x32xf32>
    %1 = tpu.concatenate %0, %0 in 1 : vector<8x32xf32>, vector<8x32xf32> -> vector<8x64xf32>
    %c0_1 = arith.constant 0 : index
    %c0_2 = arith.constant 0 : index
    %2 = vector.load %arg1[%c0_1, %c0_2] : memref<8x64xf32, #tpu.memory_space<vmem>>, vector<8x64xf32>
    %3 = arith.addf %2, %1 : vector<8x64xf32>
    %c0_3 = arith.constant 0 : index
    %c0_4 = arith.constant 0 : index
    %4 = vector.load %arg3[%c0_3, %c0_4] : memref<8x64xf32, #tpu.memory_space<vmem>>, vector<8x64xf32>
    tpu.vector_store %arg3[%c0_3, %c0_4], %3 {strides = array<i32>} : memref<8x64xf32, #tpu.memory_space<vmem>>, vector<8x64xf32>,
    return
  }
  func.func @transform_0(%arg0: i32) -> (i32, i32) {
    %c0_i32 = arith.constant 0 : i32
    %c0_i32_0 = arith.constant 0 : i32
    return %arg0, %c0_i32 : i32, i32
  }
  func.func @transform_1(%arg0: i32) -> (i32, i32) {
    %c0_i32 = arith.constant 0 : i32
    %c0_i32_0 = arith.constant 0 : i32
    return %arg0, %c0_i32 : i32, i32
  }
  func.func @transform_2(%arg0: i32) -> (i32, i32) {
    %c0_i32 = arith.constant 0 : i32
    %c0_i32_0 = arith.constant 0 : i32
    return %arg0, %c0_i32 : i32, i32
  }
}

</mosaic_0001>

<bundles_post_ra>
// kernel: tpu_custom_call.1
= control target key start
LH: loop header
LB: loop body
LE: loop exit
PB: predicated region body
PF: predicated region fallthrough
CT: control target
= control target key end

     0   :  { %7 = vsyncpa [#allocation3], 0  ;;  %s194_s0 = inlined_call_operand.hbm [shape: f32[8,64], index: 0, kind: input, shape index: {}]   ;;  %s195_s1 = inlined_call_operand.hbm [shape: f32[8,32], index: 1, kind: input, shape index: {}]   ;;  %s196_s2 = inlined_call_operand.hbm [shape: f32[8,64], index: 2, kind: output, shape index: {}]  }
   0x1   :  { %8 = vsyncpa [#allocation6], 0 }
   0x2   :  { %9 = vsyncpa [#allocation4], 0  ;;  %s139_s9 = smov [#allocation2]   ;;  %s140_s11 = smov [#allocation5]  }
   0x3   :  { %s16_s10 = sshll.u32 %s139_s9, 4  ;;  %s26_s12 = sshll.u32 %s140_s11, 4  ;;  %s17_s10 = int_to_ptr.vmem [resolvable:$true] %s16_s10  ;;  %s27_s12 = int_to_ptr.vmem [resolvable:$true] %s26_s12 }
   0x4   :  { %s67_s15 = scalar_lea.hbm %s194_s0, 128 }
   0x5   :  { %p68_p0 = scmp.ne.s32.totalorder %s194_s0, %s67_s15  ;;  %p71_p1 = scmp.lt.u32.totalorder %s67_s15, %s194_s0 }
   0x7   :  { %p73_p2 = pnand %p71_p1, %p68_p0 }
   0x9   :  { %76 = shalt.err (!%p73_p2)
}
   0xa   :  { %s77_s20 = scalar_lea.vmem %s17_s10, 128  ;;  %p82_p4 = scmp.lt.s32.totalorder %s17_s10, %s17_s10 }
   0xb   :  { %p78_p3 = scmp.ne.s32.totalorder %s17_s10, %s77_s20  ;;  %p83_p5 = scmp.lt.s32.totalorder %s77_s20, %s77_s20 }
   0xd   :  { %p84_p6 = por %p83_p5, %p82_p4 }
   0xf   :  { %p85_p7 = pnand %p84_p6, %p78_p3 }
  0x11   :  { %88 = shalt.err (!%p85_p7)
}
  0x12   :  { %19 = dma.hbm_to_vmem [thread:$0]  %s194_s0, 128, %s17_s10, [#allocation3]  }
  0x13   :  { %s89_s25 = scalar_lea.hbm %s195_s1, 128 }
  0x14   :  { %p90_p8 = scmp.ne.s32.totalorder %s195_s1, %s89_s25  ;;  %p93_p9 = scmp.lt.u32.totalorder %s89_s25, %s195_s1 }
  0x16   :  { %p95_p10 = pnand %p93_p9, %p90_p8 }
  0x18   :  { %98 = shalt.err (!%p95_p10)
}
  0x19   :  { %s99_s30 = scalar_lea.vmem %s27_s12, 128  ;;  %p104_p12 = scmp.lt.s32.totalorder %s27_s12, %s27_s12 }
  0x1a   :  { %p100_p11 = scmp.ne.s32.totalorder %s27_s12, %s99_s30  ;;  %p105_p13 = scmp.lt.s32.totalorder %s99_s30, %s99_s30 }
  0x1c   :  { %p106_p0 = por %p105_p13, %p104_p12 }
  0x1e   :  { %p107_p1 = pnand %p106_p0, %p100_p11 }
  0x20   :  { %110 = shalt.err (!%p107_p1)
}
  0x21   :  { %29 = dma.hbm_to_vmem [thread:$0]  %s195_s1, 128, %s27_s12, [#allocation6]  }
  0x22   :  { %133 = dma.done.wait [#allocation3], 128  }
  0x23   :  { %134 = vsyncadd [#allocation3], 4294967168 }
  0x24   :  { %135 = dma.done.wait [#allocation6], 128  }
  0x25   :  { %136 = vsyncadd [#allocation6], 4294967168  ;;  %v36_v0 = vld [vmem:[#allocation5] sm:$0xff]  ;;  %s141_s4 = smov 32   ;;  %vm41_vm0 = vcmask 261120   ;;  %v43_v1 = vld [vmem:[#allocation2] sm:$0xff] }
  0x26   :  { %38 = vrot.lane.b32.xlu0 %v36_v0, %s141_s4  ;;  %s142_s5 = smov [#allocation7]   ;;  %vm45_vm1 = vcmask 523264  }
  0x27   :  { %s53_s6 = sshll.u32 %s142_s5, 4  ;;  %s54_s6 = int_to_ptr.vmem [resolvable:$true] %s53_s6 }
  0x28   :  { %s111_s7 = scalar_lea.vmem %s54_s6, 128  ;;  %p116_p3 = scmp.lt.s32.totalorder %s54_s6, %s54_s6 }
  0x29   :  { %p112_p2 = scmp.ne.s32.totalorder %s54_s6, %s111_s7  ;;  %p117_p4 = scmp.lt.s32.totalorder %s111_s7, %s111_s7 }
  0x2b   :  { %p118_p5 = por %p117_p4, %p116_p3 }
  0x2d   :  { %p119_p6 = pnand %p118_p5, %p112_p2 }
  0x98   :  { %v39_v2 = vpop.permute.xlu0 %38 }
  0x99   :  { %v42_v3 = vsel %vm41_vm0, %v36_v0, %v39_v2 }
  0x9a   :  { %v44_v4 = vadd.f32 %v43_v1, %v42_v3 }
  0x9c   :  { %46 = vst.msk [vmem:[#allocation7] sm:$0xff] %vm45_vm1, %v44_v4 }
  0x9d   :  { %122 = shalt.err (!%p119_p6)
}
  0x9e   :  { %s123_s9 = scalar_lea.hbm %s196_s2, 128 }
  0x9f   :  { %p124_p7 = scmp.ne.s32.totalorder %s196_s2, %s123_s9  ;;  %p127_p8 = scmp.lt.u32.totalorder %s123_s9, %s196_s2 }
  0xa1   :  { %p129_p9 = pnand %p127_p8, %p124_p7 }
  0xa3   :  { %132 = shalt.err (!%p129_p9)
}
  0xa4   :  { %56 = dma.vmem_to_hbm [thread:$0]  %s54_s6, 128, %s196_s2, [#allocation4]  }
  0xa5   :  { %137 = dma.done.wait [#allocation4], 128  }
  0xa6   :  { %138 = vsyncadd [#allocation4], 4294967168 }
  0xa7   :  { %60 = vsyncpa [#allocation3], 1 }
  0xa8   :  { %61 = vsyncpa [#allocation6], 1 }
  0xa9   :  { %62 = vsyncpa [#allocation4], 1 }

</bundles_post_ra>
